<compile_context>
chip_gen: v7x
topology: tpu7x:2x2x1
jax: 0.10.0
libtpu: 0.0.40
codegen_flags: <defaults>
</compile_context>

<pallas_src>
import functools

import jax
import jax.numpy as jnp
from jax.experimental import pallas as pl
from jax.experimental.pallas import tpu as pltpu

EPS = 1e-5


def _round_up(n, m):
    return ((n + m - 1) // m) * m


# ----------------------------- in-kernel helpers -----------------------------

def _rmsnorm(v, w):
    ms = jnp.mean(v * v, axis=-1, keepdims=True)
    return v * jax.lax.rsqrt(ms + EPS) * w


def _silu_kernel(v):
    # sigmoid = 1 / (1 + exp(-v)); exp and approx-reciprocal both run on the EUP slot,
    # keeping the (likely binding) VALU slot free.  ~1e-3 relative error, fine for an
    # activation.
    return v * pl.reciprocal(1.0 + jnp.exp(-v), approx=True)


def _softplus(v):
    return jnp.maximum(v, 0.0) + jnp.log1p(jnp.exp(-jnp.abs(v)))


# --------------------------------- kernel ------------------------------------

def residual_block_kernel(x_ref,
                          wn_outer_ref, wn_inner_ref,
                          w_z_ref, b_z_ref,        # fused [inp_proj | D]   (D -> 2*d_inner)
                          w_cl_ref, b_cl_ref,      # conv_linear
                          w_s_ref, b_s_ref,        # fused [fc1 | fc2 | fc3 | 0-pad] -> 128 cols
                          w_out_ref, b_out_ref,    # out_proj
                          o_ref,
                          *, d_inner, state_size):
    x = x_ref[...]                                   # (tm, D) f32

    # ResidualBlock.norm then MambaBlock.norm (both RMSNorm over feature dim)
    y = _rmsnorm(x, wn_outer_ref[...])
    z = _rmsnorm(y, wn_inner_ref[...])

    def matmul(v, w_ref, b_ref):
        # bf16 MXU operands, f32 accumulation; bias added in f32.
        # TODO(synk): on v6e/v7x the whole elementwise chain could run in bf16
        # (bf16 VPU/EUP) which also removes these casts; kept f32 for v5e safety.
        return jnp.dot(v.astype(jnp.bfloat16), w_ref[...],
                       preferred_element_type=jnp.float32) + b_ref[...]

    # One fused, 128-wide matmul for the two projections of z: [inp_proj | D]
    zp = matmul(z, w_z_ref, b_z_ref)                 # (tm, 2*d_inner) = (tm, 128)
    x_proj = zp[:, :d_inner]                         # inp_proj(z)
    d_path = zp[:, d_inner:]                         # D(z)

    # inp_proj -> silu -> conv_linear
    x_conv_act = _silu_kernel(x_proj)
    x_conv_out = matmul(x_conv_act, w_cl_ref, b_cl_ref)    # (tm, d_inner)

    # One fused, lane-aligned (128-col) matmul for the S6 projections:
    # [fc1 | fc2 | fc3 | zero-pad].  (args.ssm = True; the exp(delta.A) term multiplies
    # an all-zero h -> dead code.)
    sp = matmul(x_conv_out, w_s_ref, b_s_ref)        # (tm, 128)
    delta = _softplus(sp[:, :d_inner])               # (tm, d_inner)
    Bm = sp[:, d_inner:d_inner + state_size]         # (tm, state)
    Cm = sp[:, d_inner + state_size:d_inner + 2 * state_size]
    cb = jnp.sum(Cm * Bm, axis=-1, keepdims=True)    # (tm, 1)
    x_ssm = x_conv_out * delta * cb                  # (tm, d_inner)

    # gate with silu(D(z)) and project back to model dim
    x_combined = _silu_kernel(x_ssm) * _silu_kernel(d_path)
    x_out = matmul(x_combined, w_out_ref, b_out_ref)       # (tm, D)

    # residual add of the *original* input
    # TODO(synk): D=32 leaves 96/128 lanes masked per store; a lane-dense (tm/4,128)
    # output slab needs an in-kernel (tm,32)->(tm/4,128) repack (XLU relayout / VMEM
    # round-trip) -- only worth it if a bundle dump shows vst.msk is the binding slot.
    o_ref[...] = x_out + x


# ------------------------------ host wrappers ---------------------------------

def prepare_params(params):
    """One-time weight prep: fuse matmuls sharing an operand, pad the fused S6 weight to
    128 output columns, and cast MXU operands to bf16.  Call once per weight update, NOT
    per forward."""
    d_inner = int(params["w_cl"].shape[0])
    state_size = int(params["w_fc2"].shape[1])

    # inp_proj and D both consume z -> one (D, 2*d_inner) weight.
    w_z = jnp.concatenate([params["w_inp"], params["w_d"]], axis=1).astype(jnp.bfloat16)
    b_z = jnp.concatenate([params["b_inp"], params["b_d"]], axis=1)

    # S6.fc1/fc2/fc3 all consume conv_out -> one weight, zero-padded to 128 columns so
    # the MXU output is lane-aligned (no masked result pops).
    s6_w = jnp.concatenate([params["w_fc1"], params["w_fc2"], params["w_fc3"]], axis=1)
    s6_b = jnp.concatenate([params["b_fc1"], params["b_fc2"], params["b_fc3"]], axis=1)
    pad = _round_up(s6_w.shape[1], 128) - s6_w.shape[1]
    w_s = jnp.pad(s6_w, ((0, 0), (0, pad))).astype(jnp.bfloat16)
    b_s = jnp.pad(s6_b, ((0, 0), (0, pad)))

    prepared = {
        "wn_outer": params["wn_outer"], "wn_inner": params["wn_inner"],
        "w_z": w_z, "b_z": b_z,
        "w_cl": params["w_cl"].astype(jnp.bfloat16), "b_cl": params["b_cl"],
        "w_s": w_s, "b_s": b_s,
        "w_out": params["w_out"].astype(jnp.bfloat16), "b_out": params["b_out"],
        "d_inner": d_inner, "state_size": state_size,
    }
    return jax.tree_util.tree_map(
        lambda v: jax.block_until_ready(v) if isinstance(v, jax.Array) else v, prepared)


def residual_block_pallas(x_flat, prepared, *, tm=1024):
    """x_flat: (M, D) f32.  prepared: output of prepare_params()."""
    M, D = x_flat.shape
    d_inner = prepared["d_inner"]
    state_size = prepared["state_size"]

    weight_keys = ("wn_outer", "wn_inner", "w_z", "b_z", "w_cl", "b_cl",
                   "w_s", "b_s", "w_out", "b_out")
    weights = [prepared[k] for k in weight_keys]

    # Row tile: at most tm, but small enough that the grid has >= 2 steps so v7x's two
    # TensorCores both get work (the extra grid step is noise on v5e/v6e).  No padding:
    # Pallas masks the ragged last block.
    tm_eff = max(8, min(tm, _round_up(pl.cdiv(M, 2), 8)))
    grid = (pl.cdiv(M, tm_eff),)

    in_specs = [pl.BlockSpec((tm_eff, D), lambda i: (i, 0))]
    for w in weights:
        # Constant index_map -> fetched once, stays resident in VMEM.
        in_specs.append(pl.BlockSpec(w.shape, lambda i: (0, 0)))

    # Advisory cost estimate so XLA can overlap this custom call with neighbors.
    s6_width = int(prepared["w_s"].shape[1])
    flops = 2 * M * (D * 2 * d_inner + d_inner * d_inner
                     + d_inner * s6_width + d_inner * D)
    weight_bytes = sum(int(w.size) * int(w.dtype.itemsize) for w in weights)
    cost = pl.CostEstimate(flops=int(flops),
                           transcendentals=int(M * (8 * d_inner + 2)),
                           bytes_accessed=int(2 * M * D * 4 + weight_bytes))

    kernel = functools.partial(residual_block_kernel,
                               d_inner=d_inner, state_size=state_size)

    return pl.pallas_call(
        kernel,
        out_shape=jax.ShapeDtypeStruct((M, D), x_flat.dtype),
        grid=grid,
        in_specs=in_specs,
        out_specs=pl.BlockSpec((tm_eff, D), lambda i: (i, 0)),
        compiler_params=pltpu.CompilerParams(
            dimension_semantics=("parallel",)),
        cost_estimate=cost,
    )(x_flat, *weights)


# ------------------------------ f32 reference ---------------------------------

def residual_block_reference(x_flat, params):
    """Pure-JAX, full-f32 reference of the same forward (mirrors the PyTorch module)."""
    x = x_flat
    y = _rmsnorm(x, params["wn_outer"])
    z = _rmsnorm(y, params["wn_inner"])

    def lin(v, w, b):
        return v @ params[w] + params[b]

    def silu(v):
        return v * jax.nn.sigmoid(v)

    x_conv_out = lin(silu(lin(z, "w_inp", "b_inp")), "w_cl", "b_cl")
    delta = jax.nn.softplus(lin(x_conv_out, "w_fc1", "b_fc1"))
    Bm = lin(x_conv_out, "w_fc2", "b_fc2")
    Cm = lin(x_conv_out, "w_fc3", "b_fc3")
    x_ssm = x_conv_out * delta * jnp.sum(Cm * Bm, axis=-1, keepdims=True)
    x_combined = silu(x_ssm) * silu(lin(z, "w_d", "b_d"))
    return lin(x_combined, "w_out", "b_out") + x


def init_params(key, d_model, d_inner, state_size):
    """Deterministic synthetic params mirroring the PyTorch module's shapes.
    Linear weights stored as (in, out) so the kernel does v @ W directly."""
    params = {}
    params["wn_outer"] = jnp.ones((1, d_model), jnp.float32)   # ResidualBlock.norm
    params["wn_inner"] = jnp.ones((1, d_model), jnp.float32)   # MambaBlock.norm

    def linear_init(key, fan_in, fan_out):
        kw, kb = jax.random.split(key)
        bound = 1.0 / jnp.sqrt(float(fan_in))
        w = jax.random.uniform(kw, (fan_in, fan_out), jnp.float32, -bound, bound)
        b = jax.random.uniform(kb, (1, fan_out), jnp.float32, -bound, bound)
        return w, b

    keys = jax.random.split(key, 7)
    params["w_inp"], params["b_inp"] = linear_init(keys[0], d_model, d_inner)     # inp_proj
    params["w_cl"],  params["b_cl"]  = linear_init(keys[1], d_inner, d_inner)     # conv_linear
    params["w_fc1"], params["b_fc1"] = linear_init(keys[2], d_inner, d_inner)     # S6.fc1
    params["w_fc2"], params["b_fc2"] = linear_init(keys[3], d_inner, state_size)  # S6.fc2
    params["w_fc3"], params["b_fc3"] = linear_init(keys[4], d_inner, state_size)  # S6.fc3
    params["w_d"],   params["b_d"]   = linear_init(keys[5], d_model, d_inner)     # MambaBlock.D
    params["w_out"], _               = linear_init(keys[6], d_inner, d_model)     # out_proj
    params["b_out"] = jnp.ones((1, d_model), jnp.float32)  # nn.init.constant_(out_proj.bias, 1.0)
    # Note: S6.A and MambaBlock.conv (Conv1d) never influence the forward output,
    # so they carry no parameters here.
    return params


if __name__ == "__main__":
    # small shapes consistent with the module: (batch, seq_len, num_nodes, model_dim)
    B, T, N, D = 2, 8, 4, 32
    d_inner, state_size = 64, 16

    key = jax.random.PRNGKey(0)
    k_x, k_p = jax.random.split(key)
    x = jax.random.normal(k_x, (B, T, N, D), jnp.float32)
    params = init_params(k_p, D, d_inner, state_size)

    prepared = prepare_params(params)          # one-time weight fusion + bf16 cast

    x_flat = x.reshape(B * T * N, D)
    out_flat = residual_block_pallas(x_flat, prepared)
    out = out_flat.reshape(B, T, N, D)
    jax.block_until_ready(out)

    # Validate against a full-f32 reference (kernel uses bf16 MXU operands + approximate
    # sigmoid reciprocal, hence the 1e-2 tolerance).
    ref = residual_block_reference(x_flat, params).reshape(B, T, N, D)
    max_err = jnp.max(jnp.abs(out - ref))
    assert jnp.allclose(out, ref, atol=1e-2, rtol=1e-2), f"max abs err {max_err}"

    print("KERNEL_OK")
</pallas_src>

<mosaic_0001>
module attributes {stable_mosaic.version = 11 : i64} {
  func.func @residual_block_kernel(%arg0: i32, %arg1: memref<32x32xf32, #tpu.memory_space<vmem>>, %arg2: memref<1x32xf32, #tpu.memory_space<vmem>>, %arg3: memref<1x32xf32, #tpu.memory_space<vmem>>, %arg4: memref<32x128xbf16, #tpu.memory_space<vmem>>, %arg5: memref<1x128xf32, #tpu.memory_space<vmem>>, %arg6: memref<64x64xbf16, #tpu.memory_space<vmem>>, %arg7: memref<1x64xf32, #tpu.memory_space<vmem>>, %arg8: memref<64x128xbf16, #tpu.memory_space<vmem>>, %arg9: memref<1x128xf32, #tpu.memory_space<vmem>>, %arg10: memref<64x32xbf16, #tpu.memory_space<vmem>>, %arg11: memref<1x32xf32, #tpu.memory_space<vmem>>, %arg12: memref<32x32xf32, #tpu.memory_space<vmem>>) attributes {dimension_semantics = [#tpu.dimension_semantics<parallel>], iteration_bounds = array<i64: 2>, scalar_prefetch = 0 : i64, scratch_operands = 0 : i64, tpu.core_type = #tpu.core_type<tc>, window_params = [{transform_indices = @transform_0, window_bounds = array<i64: 32, 32>}, {pipeline_mode = #tpu.pipeline_mode<synchronous>, transform_indices = @transform_1, window_bounds = array<i64: 1, 32>}, {pipeline_mode = #tpu.pipeline_mode<synchronous>, transform_indices = @transform_2, window_bounds = array<i64: 1, 32>}, {pipeline_mode = #tpu.pipeline_mode<synchronous>, transform_indices = @transform_3, window_bounds = array<i64: 32, 128>}, {pipeline_mode = #tpu.pipeline_mode<synchronous>, transform_indices = @transform_4, window_bounds = array<i64: 1, 128>}, {pipeline_mode = #tpu.pipeline_mode<synchronous>, transform_indices = @transform_5, window_bounds = array<i64: 64, 64>}, {pipeline_mode = #tpu.pipeline_mode<synchronous>, transform_indices = @transform_6, window_bounds = array<i64: 1, 64>}, {pipeline_mode = #tpu.pipeline_mode<synchronous>, transform_indices = @transform_7, window_bounds = array<i64: 64, 128>}, {pipeline_mode = #tpu.pipeline_mode<synchronous>, transform_indices = @transform_8, window_bounds = array<i64: 1, 128>}, {pipeline_mode = #tpu.pipeline_mode<synchronous>, transform_indices = @transform_9, window_bounds = array<i64: 64, 32>}, {pipeline_mode = #tpu.pipeline_mode<synchronous>, transform_indices = @transform_10, window_bounds = array<i64: 1, 32>}, {transform_indices = @transform_11, window_bounds = array<i64: 32, 32>}]} {
    %c0 = arith.constant 0 : index
    %c0_0 = arith.constant 0 : index
    %0 = vector.load %arg1[%c0, %c0_0] : memref<32x32xf32, #tpu.memory_space<vmem>>, vector<32x32xf32>
    %c0_1 = arith.constant 0 : index
    %c0_2 = arith.constant 0 : index
    %1 = vector.load %arg2[%c0_1, %c0_2] : memref<1x32xf32, #tpu.memory_space<vmem>>, vector<1x32xf32>
    %2 = arith.mulf %0, %0 : vector<32x32xf32>
    %cst = arith.constant dense<0.000000e+00> : vector<32xf32>
    %3 = vector.multi_reduction <add>, %2, %cst [1] : vector<32x32xf32> to vector<32xf32>
    %4 = vector.shape_cast %3 : vector<32xf32> to vector<32x1xf32>
    %cst_3 = arith.constant 3.200000e+01 : f32
    %5 = vector.broadcast %cst_3 : f32 to vector<32x1xf32>
    %6 = arith.divf %4, %5 : vector<32x1xf32>
    %cst_4 = arith.constant 9.99999974E-6 : f32
    %7 = vector.broadcast %cst_4 : f32 to vector<32x1xf32>
    %8 = arith.addf %6, %7 : vector<32x1xf32>
    %9 = math.rsqrt %8 : vector<32x1xf32>
    %10 = vector.broadcast %9 : vector<32x1xf32> to vector<32x32xf32>
    %11 = arith.mulf %0, %10 : vector<32x32xf32>
    %12 = vector.broadcast %1 : vector<1x32xf32> to vector<32x32xf32>
    %13 = arith.mulf %11, %12 : vector<32x32xf32>
    %c0_5 = arith.constant 0 : index
    %c0_6 = arith.constant 0 : index
    %14 = vector.load %arg3[%c0_5, %c0_6] : memref<1x32xf32, #tpu.memory_space<vmem>>, vector<1x32xf32>
    %15 = arith.mulf %13, %13 : vector<32x32xf32>
    %cst_7 = arith.constant dense<0.000000e+00> : vector<32xf32>
    %16 = vector.multi_reduction <add>, %15, %cst_7 [1] : vector<32x32xf32> to vector<32xf32>
    %17 = vector.shape_cast %16 : vector<32xf32> to vector<32x1xf32>
    %cst_8 = arith.constant 3.200000e+01 : f32
    %18 = vector.broadcast %cst_8 : f32 to vector<32x1xf32>
    %19 = arith.divf %17, %18 : vector<32x1xf32>
    %cst_9 = arith.constant 9.99999974E-6 : f32
    %20 = vector.broadcast %cst_9 : f32 to vector<32x1xf32>
    %21 = arith.addf %19, %20 : vector<32x1xf32>
    %22 = math.rsqrt %21 : vector<32x1xf32>
    %23 = vector.broadcast %22 : vector<32x1xf32> to vector<32x32xf32>
    %24 = arith.mulf %13, %23 : vector<32x32xf32>
    %25 = vector.broadcast %14 : vector<1x32xf32> to vector<32x32xf32>
    %26 = arith.mulf %24, %25 : vector<32x32xf32>
    %27 = arith.truncf %26 : vector<32x32xf32> to vector<32x32xbf16>
    %c0_10 = arith.constant 0 : index
    %c0_11 = arith.constant 0 : index
    %28 = vector.load %arg4[%c0_10, %c0_11] : memref<32x128xbf16, #tpu.memory_space<vmem>>, vector<32x128xbf16>
    %cst_12 = arith.constant dense<0.000000e+00> : vector<32x128xf32>
    %29 = tpu.matmul %27, %28, %cst_12 {dimension_numbers = #tpu.dot_dimension_numbers<[1], [0], [0], [1], [0, 0, 1, 1], [], []>} : vector<32x32xbf16>, vector<32x128xbf16>, vector<32x128xf32> -> vector<32x128xf32>
    %c0_13 = arith.constant 0 : index
    %c0_14 = arith.constant 0 : index
    %30 = vector.load %arg5[%c0_13, %c0_14] : memref<1x128xf32, #tpu.memory_space<vmem>>, vector<1x128xf32>
    %31 = vector.broadcast %30 : vector<1x128xf32> to vector<32x128xf32>
    %32 = arith.addf %29, %31 : vector<32x128xf32>
    %33 = vector.extract_strided_slice %32 {offsets = [0, 0], sizes = [32, 64], strides = [1, 1]} : vector<32x128xf32> to vector<32x64xf32>
    %34 = vector.extract_strided_slice %32 {offsets = [0, 64], sizes = [32, 64], strides = [1, 1]} : vector<32x128xf32> to vector<32x64xf32>
    %cst_15 = arith.constant 0.000000e+00 : f32
    %35 = vector.broadcast %cst_15 : f32 to vector<32x64xf32>
    %36 = arith.subf %35, %33 : vector<32x64xf32>
    %37 = math.exp %36 : vector<32x64xf32>
    %cst_16 = arith.constant 1.000000e+00 : f32
    %38 = vector.broadcast %cst_16 : f32 to vector<32x64xf32>
    %39 = arith.addf %38, %37 : vector<32x64xf32>
    %40 = tpu.reciprocal %39 {approx = true} : vector<32x64xf32> -> vector<32x64xf32>
    %41 = arith.mulf %33, %40 : vector<32x64xf32>
    %42 = arith.truncf %41 : vector<32x64xf32> to vector<32x64xbf16>
    %c0_17 = arith.constant 0 : index
    %c0_18 = arith.constant 0 : index
    %43 = vector.load %arg6[%c0_17, %c0_18] : memref<64x64xbf16, #tpu.memory_space<vmem>>, vector<64x64xbf16>
    %cst_19 = arith.constant dense<0.000000e+00> : vector<32x64xf32>
    %44 = tpu.matmul %42, %43, %cst_19 {dimension_numbers = #tpu.dot_dimension_numbers<[1], [0], [0], [1], [0, 0, 1, 1], [], []>} : vector<32x64xbf16>, vector<64x64xbf16>, vector<32x64xf32> -> vector<32x64xf32>
    %c0_20 = arith.constant 0 : index
    %c0_21 = arith.constant 0 : index
    %45 = vector.load %arg7[%c0_20, %c0_21] : memref<1x64xf32, #tpu.memory_space<vmem>>, vector<1x64xf32>
    %46 = vector.broadcast %45 : vector<1x64xf32> to vector<32x64xf32>
    %47 = arith.addf %44, %46 : vector<32x64xf32>
    %48 = arith.truncf %47 : vector<32x64xf32> to vector<32x64xbf16>
    %c0_22 = arith.constant 0 : index
    %c0_23 = arith.constant 0 : index
    %49 = vector.load %arg8[%c0_22, %c0_23] : memref<64x128xbf16, #tpu.memory_space<vmem>>, vector<64x128xbf16>
    %cst_24 = arith.constant dense<0.000000e+00> : vector<32x128xf32>
    %50 = tpu.matmul %48, %49, %cst_24 {dimension_numbers = #tpu.dot_dimension_numbers<[1], [0], [0], [1], [0, 0, 1, 1], [], []>} : vector<32x64xbf16>, vector<64x128xbf16>, vector<32x128xf32> -> vector<32x128xf32>
    %c0_25 = arith.constant 0 : index
    %c0_26 = arith.constant 0 : index
    %51 = vector.load %arg9[%c0_25, %c0_26] : memref<1x128xf32, #tpu.memory_space<vmem>>, vector<1x128xf32>
    %52 = vector.broadcast %51 : vector<1x128xf32> to vector<32x128xf32>
    %53 = arith.addf %50, %52 : vector<32x128xf32>
    %54 = vector.extract_strided_slice %53 {offsets = [0, 0], sizes = [32, 64], strides = [1, 1]} : vector<32x128xf32> to vector<32x64xf32>
    %cst_27 = arith.constant 0.000000e+00 : f32
    %55 = vector.broadcast %cst_27 : f32 to vector<32x64xf32>
    %56 = arith.maximumf %54, %55 : vector<32x64xf32>
    %57 = math.absf %54 : vector<32x64xf32>
    %cst_28 = arith.constant 0.000000e+00 : f32
    %58 = vector.broadcast %cst_28 : f32 to vector<32x64xf32>
    %59 = arith.subf %58, %57 : vector<32x64xf32>
    %60 = math.exp %59 : vector<32x64xf32>
    %61 = math.log1p %60 : vector<32x64xf32>
    %62 = arith.addf %56, %61 : vector<32x64xf32>
    %63 = vector.extract_strided_slice %53 {offsets = [0, 64], sizes = [32, 16], strides = [1, 1]} : vector<32x128xf32> to vector<32x16xf32>
    %64 = vector.extract_strided_slice %53 {offsets = [0, 80], sizes = [32, 16], strides = [1, 1]} : vector<32x128xf32> to vector<32x16xf32>
    %65 = arith.mulf %64, %63 : vector<32x16xf32>
    %cst_29 = arith.constant dense<0.000000e+00> : vector<32xf32>
    %66 = vector.multi_reduction <add>, %65, %cst_29 [1] : vector<32x16xf32> to vector<32xf32>
    %67 = vector.shape_cast %66 : vector<32xf32> to vector<32x1xf32>
    %68 = arith.mulf %47, %62 : vector<32x64xf32>
    %69 = vector.broadcast %67 : vector<32x1xf32> to vector<32x64xf32>
    %70 = arith.mulf %68, %69 : vector<32x64xf32>
    %cst_30 = arith.constant 0.000000e+00 : f32
    %71 = vector.broadcast %cst_30 : f32 to vector<32x64xf32>
    %72 = arith.subf %71, %70 : vector<32x64xf32>
    %73 = math.exp %72 : vector<32x64xf32>
    %cst_31 = arith.constant 1.000000e+00 : f32
    %74 = vector.broadcast %cst_31 : f32 to vector<32x64xf32>
    %75 = arith.addf %74, %73 : vector<32x64xf32>
    %76 = tpu.reciprocal %75 {approx = true} : vector<32x64xf32> -> vector<32x64xf32>
    %77 = arith.mulf %70, %76 : vector<32x64xf32>
    %cst_32 = arith.constant 0.000000e+00 : f32
    %78 = vector.broadcast %cst_32 : f32 to vector<32x64xf32>
    %79 = arith.subf %78, %34 : vector<32x64xf32>
    %80 = math.exp %79 : vector<32x64xf32>
    %cst_33 = arith.constant 1.000000e+00 : f32
    %81 = vector.broadcast %cst_33 : f32 to vector<32x64xf32>
    %82 = arith.addf %81, %80 : vector<32x64xf32>
    %83 = tpu.reciprocal %82 {approx = true} : vector<32x64xf32> -> vector<32x64xf32>
    %84 = arith.mulf %34, %83 : vector<32x64xf32>
    %85 = arith.mulf %77, %84 : vector<32x64xf32>
    %86 = arith.truncf %85 : vector<32x64xf32> to vector<32x64xbf16>
    %c0_34 = arith.constant 0 : index
    %c0_35 = arith.constant 0 : index
    %87 = vector.load %arg10[%c0_34, %c0_35] : memref<64x32xbf16, #tpu.memory_space<vmem>>, vector<64x32xbf16>
    %cst_36 = arith.constant dense<0.000000e+00> : vector<32x32xf32>
    %88 = tpu.matmul %86, %87, %cst_36 {dimension_numbers = #tpu.dot_dimension_numbers<[1], [0], [0], [1], [0, 0, 1, 1], [], []>} : vector<32x64xbf16>, vector<64x32xbf16>, vector<32x32xf32> -> vector<32x32xf32>
    %c0_37 = arith.constant 0 : index
    %c0_38 = arith.constant 0 : index
    %89 = vector.load %arg11[%c0_37, %c0_38] : memref<1x32xf32, #tpu.memory_space<vmem>>, vector<1x32xf32>
    %90 = vector.broadcast %89 : vector<1x32xf32> to vector<32x32xf32>
    %91 = arith.addf %88, %90 : vector<32x32xf32>
    %92 = arith.addf %91, %0 : vector<32x32xf32>
    %c0_39 = arith.constant 0 : index
    %c0_40 = arith.constant 0 : index
    %93 = vector.load %arg12[%c0_39, %c0_40] : memref<32x32xf32, #tpu.memory_space<vmem>>, vector<32x32xf32>
    tpu.vector_store %arg12[%c0_39, %c0_40], %92 {strides = array<i32>} : memref<32x32xf32, #tpu.memory_space<vmem>>, vector<32x32xf32>,
    return
  }
  func.func @transform_0(%arg0: i32) -> (i32, i32) {
    %c0_i32 = arith.constant 0 : i32
    %c0_i32_0 = arith.constant 0 : i32
    return %arg0, %c0_i32 : i32, i32
  }
  func.func @transform_1(%arg0: i32) -> (i32, i32) {
    %c0_i32 = arith.constant 0 : i32
    %c0_i32_0 = arith.constant 0 : i32
    %c0_i32_1 = arith.constant 0 : i32
    return %c0_i32, %c0_i32_0 : i32, i32
  }
  func.func @transform_2(%arg0: i32) -> (i32, i32) {
    %c0_i32 = arith.constant 0 : i32
    %c0_i32_0 = arith.constant 0 : i32
    %c0_i32_1 = arith.constant 0 : i32
    return %c0_i32, %c0_i32_0 : i32, i32
  }
  func.func @transform_3(%arg0: i32) -> (i32, i32) {
    %c0_i32 = arith.constant 0 : i32
    %c0_i32_0 = arith.constant 0 : i32
    %c0_i32_1 = arith.constant 0 : i32
    return %c0_i32, %c0_i32_0 : i32, i32
  }
  func.func @transform_4(%arg0: i32) -> (i32, i32) {
    %c0_i32 = arith.constant 0 : i32
    %c0_i32_0 = arith.constant 0 : i32
    %c0_i32_1 = arith.constant 0 : i32
    return %c0_i32, %c0_i32_0 : i32, i32
  }
  func.func @transform_5(%arg0: i32) -> (i32, i32) {
    %c0_i32 = arith.constant 0 : i32
    %c0_i32_0 = arith.constant 0 : i32
    %c0_i32_1 = arith.constant 0 : i32
    return %c0_i32, %c0_i32_0 : i32, i32
  }
  func.func @transform_6(%arg0: i32) -> (i32, i32) {
    %c0_i32 = arith.constant 0 : i32
    %c0_i32_0 = arith.constant 0 : i32
    %c0_i32_1 = arith.constant 0 : i32
    return %c0_i32, %c0_i32_0 : i32, i32
  }
  func.func @transform_7(%arg0: i32) -> (i32, i32) {
    %c0_i32 = arith.constant 0 : i32
    %c0_i32_0 = arith.constant 0 : i32
    %c0_i32_1 = arith.constant 0 : i32
    return %c0_i32, %c0_i32_0 : i32, i32
  }
  func.func @transform_8(%arg0: i32) -> (i32, i32) {
    %c0_i32 = arith.constant 0 : i32
    %c0_i32_0 = arith.constant 0 : i32
    %c0_i32_1 = arith.constant 0 : i32
    return %c0_i32, %c0_i32_0 : i32, i32
  }
  func.func @transform_9(%arg0: i32) -> (i32, i32) {
    %c0_i32 = arith.constant 0 : i32
    %c0_i32_0 = arith.constant 0 : i32
    %c0_i32_1 = arith.constant 0 : i32
    return %c0_i32, %c0_i32_0 : i32, i32
  }
  func.func @transform_10(%arg0: i32) -> (i32, i32) {
    %c0_i32 = arith.constant 0 : i32
    %c0_i32_0 = arith.constant 0 : i32
    %c0_i32_1 = arith.constant 0 : i32
    return %c0_i32, %c0_i32_0 : i32, i32
  }
  func.func @transform_11(%arg0: i32) -> (i32, i32) {
    %c0_i32 = arith.constant 0 : i32
    %c0_i32_0 = arith.constant 0 : i32
    return %arg0, %c0_i32 : i32, i32
  }
}

</mosaic_0001>

<bundles_post_ra>
// kernel: tpu_custom_call.1
= control target key start
LH: loop header
LB: loop body
LE: loop exit
PB: predicated region body
PF: predicated region fallthrough
CT: control target
= control target key end

     0   :  { %s1366_s17 = smov 0   ;;  %s1550_s0 = inlined_call_operand.vmem [shape: f32[64,32], index: 0, kind: input, shape index: {}]   ;;  %s1551_s1 = inlined_call_operand.vmem [shape: f32[1,32], index: 1, kind: input, shape index: {}]   ;;  %s1552_s2 = inlined_call_operand.vmem [shape: f32[1,32], index: 2, kind: input, shape index: {}]   ;;  %s1553_s3 = inlined_call_operand.vmem [shape: bf16[32,128], index: 3, kind: input, shape index: {}]   ;;  %s1554_s4 = inlined_call_operand.vmem [shape: f32[1,128], index: 4, kind: input, shape index: {}]   ;;  %s1555_s5 = inlined_call_operand.vmem [shape: bf16[64,64], index: 5, kind: input, shape index: {}]   ;;  %s1556_s6 = inlined_call_operand.vmem [shape: f32[1,64], index: 6, kind: input, shape index: {}]   ;;  %s1557_s7 = inlined_call_operand.vmem [shape: bf16[64,128], index: 7, kind: input, shape index: {}]   ;;  %s1558_s8 = inlined_call_operand.vmem [shape: f32[1,128], index: 8, kind: input, shape index: {}]   ;;  %s1559_s9 = inlined_call_operand.vmem [shape: bf16[64,32], index: 9, kind: input, shape index: {}]   ;;  %s1560_s10 = inlined_call_operand.vmem [shape: f32[1,32], index: 10, kind: input, shape index: {}]   ;;  %s1561_s11 = inlined_call_operand.vmem [shape: f32[64,32], index: 11, kind: output, shape index: {}]  }
   0x1 LB: > { %s1101_s18 = sadd.s32 4294967295, %s1301_s17   ;;  %p1105_p0 = scmp.ge.s32.totalorder %s1301_s17, 1  ;;  %s1301_s17 = sphi %s1366_s17, %s21_s17  }
   0x2   : > { %p338_p1 = scmp.lt.s32.totalorder %s1301_s17, 3 }
   0x4   : > { %p339_p2 = pnand %p1105_p0, %p338_p1 }
   0x5   : > { %s1106_s19 = sshll.u32 (!%p339_p2), %s1101_s18, 2  ;;  %vm400_vm0 = vcmask (!%p339_p2), 261120   ;;  %v1110_v25 = vld [vmem:[%s1551_s1] ss:$0 sm:$0xff] (!%p339_p2)  ;;  %v1218_v46 = vld [vmem:[%s1553_s3 + $0x8] sm:$0xff] (!%p339_p2)   ;;  %vm628_vm1 = vcmask (!%p339_p2), 523264  }
   0x6   : > { %342 = sbr.rel (%p339_p2) target bundleno = 1679 (0x68f), region = 64  ;;  %p379_p3 = scmp.lt.s32.totalorder (!%p339_p2), %s1106_s19, 7  ;;  %v1217_v45 = vld [vmem:[%s1553_s3] sm:$0xff] (!%p339_p2)   ;;  %vm876_vm2 = vcmask (!%p339_p2), 130048  }
   0x7   : > { %1162 = vmatprep.subr.bf16.mxu0 (!%p339_p2), %v1217_v45  ;;  %v1111_v62 = vld [vmem:[%s1552_s2] ss:$0 sm:$0xff] (!%p339_p2)  ;;  %s1303_s22 = smov (!%p339_p2), 16   ;;  %s1305_s24 = smov (!%p339_p2), 64  }
   0x8   : > { %1163 = vmatpush3.bf16.msra.mxu0 (!%p339_p2), %v1217_v45 }
   0x9   : > { %1164 = vmatprep.subr.bf16.mxu0 (!%p339_p2), %v1218_v46 }
   0xc   : > { %1165 = vmatpush3.bf16.msra.mxu0 (!%p339_p2), %v1218_v46 }
   0xd   : > { %s1563_s19 = smov (!%p379_p3, %s1106_s19), 7 }
   0xe   : > { %s1107_s20 = sshll.u32 %s1563_s19, 3 }
   0xf   : > { %s382_s23 = scalar_lea.vmem %s1550_s0, %s1107_s20  ;;  %s388_s21 = scalar_lea.vmem %s1561_s11, %s1107_s20 }
  0x10   : > { %v1382_v0 = vld [vmem:[%s382_s23] sm:$0xff]  ;;  %v1384_v1 = vld [vmem:[%s382_s23 + $0x10] sm:$0xff]  ;;  %v1386_v2 = vld [vmem:[%s382_s23 + $0x8] sm:$0xff] }
  0x11   : > { %v396_v3 = vmul.f32 %v1382_v0, %v1382_v0  ;;  %v398_v4 = vmul.f32 %v1384_v1, %v1384_v1  ;;  %v397_v5 = vmul.f32 %v1386_v2, %v1386_v2  ;;  %v1394_v6 = vld [vmem:[%s382_s23 + $0x18] sm:$0xff]  ;;  %s1304_s23 = smov 48  }
  0x12   : > { %v399_v7 = vmul.f32 %v1394_v6, %v1394_v6 }
  0x13   : > { %v401_v8 = vsel %vm400_vm0, %v396_v3, 0.0  ;;  %v407_v9 = vsel %vm400_vm0, %v398_v4, 0.0  ;;  %v404_v10 = vsel %vm400_vm0, %v397_v5, 0.0 }
  0x14   : > { %402 = vadd.xlane.f32.xlu0 %v401_v8  ;;  %408 = vadd.xlane.f32.xlu1 %v407_v9  ;;  %v410_v11 = vsel %vm400_vm0, %v399_v7, 0.0 }
  0x18   : > { %405 = vadd.xlane.f32.xlu0 %v404_v10  ;;  %411 = vadd.xlane.f32.xlu1 %v410_v11 }
  0xa1   : > { %v403_v12 = vpop.xlane.xlu0 %402  ;;  %v409_v13 = vpop.xlane.xlu1 %408 }
  0xa2   : > { %v414_v14 = vmul.f32 0.03125, %v403_v12  ;;  %v416_v15 = vmul.f32 0.03125, %v409_v13 }
  0xa4   : > { %v418_v16 = vadd.f32 1e-05, %v414_v14  ;;  %v420_v17 = vadd.f32 1e-05, %v416_v15  ;;  %v1219_v14 = vld [vmem:[%s1555_s5] sm:$0xff]   ;;  %v1220_v15 = vld [vmem:[%s1555_s5 + $0x8] sm:$0xff]  }
  0xa5   : > { %v406_v18 = vpop.xlane.xlu0 %405  ;;  %v412_v19 = vpop.xlane.xlu1 %411  ;;  %1170 = vmatprep.subr.bf16.mxu1 %v1219_v14 }
  0xa6   : > { %1231 = vrsqrt.f32 %v418_v16  ;;  %v415_v20 = vmul.f32 0.03125, %v406_v18  ;;  %v417_v21 = vmul.f32 0.03125, %v412_v19  ;;  %1171 = vmatpush3.bf16.msra.mxu1 %v1219_v14  ;;  %v1221_v16 = vld [vmem:[%s1555_s5 + $0x10] sm:$0xff]   ;;  %v1223_v18 = vld [vmem:[%s1557_s7] sm:$0xff]   ;;  %v1224_v19 = vld [vmem:[%s1557_s7 + $0x8] sm:$0xff]  }
  0xa7   : > { %1233 = vrsqrt.f32 %v420_v17  ;;  %1172 = vmatprep.subr.bf16.mxu1 %v1220_v15  ;;  %v1222_v17 = vld [vmem:[%s1555_s5 + $0x18] sm:$0xff]   ;;  %1182 = vmatprep.subr.bf16.mxu0 %v1223_v18 }
  0xa8   : > { %v419_v22 = vadd.f32 1e-05, %v415_v20  ;;  %v421_v23 = vadd.f32 1e-05, %v417_v21  ;;  %v1112_v20 = vld [vmem:[%s1554_s4] ss:$0 sm:$0xff] }
  0xaa   : > { %1235 = vrsqrt.f32 %v419_v22  ;;  %1173 = vmatpush3.bf16.msra.mxu1 %v1220_v15 }
  0xab   : > { %1237 = vrsqrt.f32 %v421_v23  ;;  %1174 = vmatprep.subr.bf16.mxu1 %v1221_v16 }
  0xae   : > { %1175 = vmatpush3.bf16.msra.mxu1 %v1221_v16 }
  0xaf   : > { %1176 = vmatprep.subr.bf16.mxu1 %v1222_v17 }
  0xb0   : > { %v1232_v24 = vpop.eup %1231 }
  0xb1   : > { %v1234_v26 = vpop.eup %1233  ;;  %v426_v27 = vmul.f32 %v1232_v24, %v1382_v0 }
  0xb2   : > { %v428_v28 = vmul.f32 %v1234_v26, %v1384_v1  ;;  %1177 = vmatpush3.bf16.msra.mxu1 %v1222_v17 }
  0xb3   : > { %v436_v29 = vmul.f32 %v1110_v25, %v426_v27 }
  0xb4   : > { %v1236_v30 = vpop.eup %1235  ;;  %v438_v31 = vmul.f32 %v1110_v25, %v428_v28 }
  0xb5   : > { %v1238_v32 = vpop.eup %1237  ;;  %v441_v33 = vmul.f32 %v436_v29, %v436_v29  ;;  %v427_v34 = vmul.f32 %v1236_v30, %v1386_v2 }
  0xb6   : > { %v443_v35 = vmul.f32 %v438_v31, %v438_v31  ;;  %v429_v36 = vmul.f32 %v1238_v32, %v1394_v6 }
  0xb7   : > { %v445_v37 = vsel %vm400_vm0, %v441_v33, 0.0  ;;  %v437_v38 = vmul.f32 %v1110_v25, %v427_v34 }
  0xb8   : > { %446 = vadd.xlane.f32.xlu0 %v445_v37  ;;  %v439_v39 = vmul.f32 %v1110_v25, %v429_v36  ;;  %v451_v40 = vsel %vm400_vm0, %v443_v35, 0.0 }
  0xb9   : > { %v442_v41 = vmul.f32 %v437_v38, %v437_v38 }
  0xba   : > { %v444_v42 = vmul.f32 %v439_v39, %v439_v39 }
  0xbb   : > { %v448_v43 = vsel %vm400_vm0, %v442_v41, 0.0 }
  0xbc   : > { %452 = vadd.xlane.f32.xlu0 %v451_v40  ;;  %449 = vadd.xlane.f32.xlu1 %v448_v43  ;;  %v454_v44 = vsel %vm400_vm0, %v444_v42, 0.0 }
  0xc0   : > { %455 = vadd.xlane.f32.xlu1 %v454_v44 }
 0x145   : > { %v447_v47 = vpop.xlane.xlu0 %446 }
 0x146   : > { %v457_v48 = vmul.f32 0.03125, %v447_v47 }
 0x148   : > { %v461_v49 = vadd.f32 1e-05, %v457_v48 }
 0x149   : > { %v450_v50 = vpop.xlane.xlu1 %449  ;;  %v453_v51 = vpop.xlane.xlu0 %452 }
 0x14a   : > { %1239 = vrsqrt.f32 %v461_v49  ;;  %v458_v52 = vmul.f32 0.03125, %v450_v50  ;;  %v459_v53 = vmul.f32 0.03125, %v453_v51 }
 0x14c   : > { %v462_v54 = vadd.f32 1e-05, %v458_v52  ;;  %v463_v55 = vadd.f32 1e-05, %v459_v53 }
 0x14d   : > { %v456_v56 = vpop.xlane.xlu1 %455 }
 0x14e   : > { %1241 = vrsqrt.f32 %v462_v54  ;;  %v460_v57 = vmul.f32 0.03125, %v456_v56  ;;  %v1226_v56 = vld [vmem:[%s1557_s7 + $0x18] sm:$0xff]  }
 0x14f   : > { %1243 = vrsqrt.f32 %v463_v55  ;;  %v1225_v55 = vld [vmem:[%s1557_s7 + $0x10] sm:$0xff]  }
 0x150   : > { %v464_v58 = vadd.f32 1e-05, %v460_v57 }
 0x152   : > { %1245 = vrsqrt.f32 %v464_v58  ;;  %v1117_v58 = vld [vmem:[%s1556_s6] ss:$0 sm:$0xff] }
 0x154   : > { %v1240_v59 = vpop.eup %1239 }
 0x155   : > { %v469_v60 = vmul.f32 %v1240_v59, %v436_v29 }
 0x157   : > { %v479_v4 = vmul.f32 %v1111_v62, %v469_v60 }
 0x158   : > { %v1242_v61 = vpop.eup %1241 }
 0x159   : > { %v1244_v63 = vpop.eup %1243  ;;  %v470_v3 = vmul.f32 %v1242_v61, %v437_v38 }
 0x15a   : > { %v471_v7 = vmul.f32 %v1244_v63, %v438_v31 }
 0x15b   : > { %v480_v5 = vmul.f32 %v1111_v62, %v470_v3 }
 0x15c   : > { %v1246_v8 = vpop.eup %1245  ;;  %v481_v11 = vmul.f32 %v1111_v62, %v471_v7 }
 0x15d   : > { %v483_v9 = vpack.c.bf16 %v480_v5, %v479_v4  ;;  %v472_v10 = vmul.f32 %v1246_v8, %v439_v39  ;;  %v1124_v8 = vld [vmem:[%s1558_s8] ss:$0 sm:$0xff] }
 0x15f   : > { %1166 = vmatprep.mubr.msk.bf16.mxu0 %vm400_vm0, %v483_v9  ;;  %v482_v12 = vmul.f32 %v1111_v62, %v472_v10 }
 0x161   : > { %v484_v13 = vpack.c.bf16 %v482_v12, %v481_v11 }
 0x163   : > { %1167 = vmatmul.mubr.msk.bf16.vlgmr.msra.gmra.mrb[0].mxu0 %vm400_vm0, %v484_v13 }
 0x164   : > { %1183 = vmatpush3.bf16.msra.mxu0 %v1223_v18 }
 0x165   : > { %1184 = vmatprep.subr.bf16.mxu0 %v1224_v19 }
 0x168   : > { %1185 = vmatpush3.bf16.msra.mxu0 %v1224_v19 }
 0x169   : > { %1186 = vmatprep.subr.bf16.mxu0 %v1225_v55 }
 0x16c   : > { %1187 = vmatpush3.bf16.msra.mxu0 %v1225_v55 }
 0x16d   : > { %1188 = vmatprep.subr.bf16.mxu0 %v1226_v56 }
 0x170   : > { %1189 = vmatpush3.bf16.msra.mxu0 %v1226_v56 }
 0x236   : > { %v1168_v21 = vpop.f32.mrb[0].mxu0 }
 0x237   : > { %v557_v22 = vadd.f32 %v1168_v21, %v1112_v20  ;;  %v548_v23 = vpop.f32.mrb[1].mxu0 }
 0x238   : > { %v549_v24 = vadd.f32 %v1112_v20, %v548_v23  ;;  %v1169_v25 = vpop.f32.mrb[2].mxu0 }
 0x239   : > { %v565_v26 = vsub.f32 0.0, %v557_v22  ;;  %v560_v27 = vadd.f32 %v1169_v25, %v1112_v20  ;;  %v551_v28 = vpop.f32.mrb[3].mxu0 }
 0x23a   : > { %v563_v29 = vsub.f32 0.0, %v549_v24  ;;  %v552_v30 = vadd.f32 %v1112_v20, %v551_v28 }
 0x23b   : > { %v571_v31 = vmul.f32 1.442695, %v565_v26  ;;  %v566_v32 = vsub.f32 0.0, %v560_v27 }
 0x23c   : > { %v567_v33 = vmul.f32 1.442695, %v563_v29  ;;  %v564_v34 = vsub.f32 0.0, %v552_v30 }
 0x23d   : > { %1247 = vpow2.f32 %v571_v31  ;;  %v573_v35 = vmul.f32 1.442695, %v566_v32 }
 0x23e   : > { %1249 = vpow2.f32 %v567_v33  ;;  %v569_v36 = vmul.f32 1.442695, %v564_v34  ;;  %v1227_v33 = vld [vmem:[%s1559_s9] sm:$0xff]   ;;  %v1228_v34 = vld [vmem:[%s1559_s9 + $0x8] sm:$0xff]  }
 0x23f   : > { %1251 = vpow2.f32 %v573_v35  ;;  %1194 = vmatprep.subr.bf16.mxu1 %v1227_v33  ;;  %v1229_v35 = vld [vmem:[%s1559_s9 + $0x10] sm:$0xff]  }
 0x240   : > { %1253 = vpow2.f32 %v569_v36  ;;  %v1230_v36 = vld [vmem:[%s1559_s9 + $0x18] sm:$0xff]  }
 0x247   : > { %v1248_v37 = vpop.eup %1247 }
 0x248   : > { %v1250_v38 = vpop.eup %1249  ;;  %v577_v39 = vadd.f32 1.0, %v1248_v37 }
 0x249   : > { %v1252_v40 = vpop.eup %1251  ;;  %v575_v41 = vadd.f32 1.0, %v1250_v38 }
 0x24a   : > { %v1254_v42 = vpop.eup %1253  ;;  %1255 = vrcp.f32 %v577_v39  ;;  %v578_v43 = vadd.f32 1.0, %v1252_v40 }
 0x24b   : > { %1257 = vrcp.f32 %v575_v41  ;;  %v576_v44 = vadd.f32 1.0, %v1254_v42 }
 0x24c   : > { %1259 = vrcp.f32 %v578_v43 }
 0x24d   : > { %1261 = vrcp.f32 %v576_v44 }
 0x254   : > { %v1256_v45 = vpop.eup %1255 }
 0x255   : > { %v1258_v46 = vpop.eup %1257  ;;  %v1451_v52 = vmul.f32 %v1256_v45, %v557_v22 }
 0x256   : > { %v1260_v47 = vpop.eup %1259  ;;  %v1447_v50 = vmul.f32 %v1258_v46, %v549_v24 }
 0x257   : > { %v1262_v48 = vpop.eup %1261  ;;  %v1445_v49 = vmul.f32 %v1260_v47, %v560_v27 }
 0x258   : > { %v1449_v51 = vmul.f32 %v1262_v48, %v552_v30 }
 0x259   : > { %v588_v54 = vpack.c.bf16 %v1445_v49, %v1451_v52 }
 0x25a   : > { %v587_v53 = vpack.c.bf16 %v1449_v51, %v1447_v50 }
 0x25c   : > { %1178 = vmatprep.mubr.msk.bf16.mxu1 %vm628_vm1, %v587_v53 }
 0x25d   : > { %1179 = vmatmul.mubr.msk.bf16.vlgmr.msra.gmra.mrb[0].mxu1 %vm628_vm1, %v588_v54 }
 0x25e   : > { %1195 = vmatpush3.bf16.msra.mxu1 %v1227_v33 }
 0x25f   : > { %1196 = vmatprep.subr.bf16.mxu1 %v1228_v34 }
 0x262   : > { %1197 = vmatpush3.bf16.msra.mxu1 %v1228_v34 }
 0x263   : > { %1198 = vmatprep.subr.bf16.mxu1 %v1229_v35 }
 0x266   : > { %1199 = vmatpush3.bf16.msra.mxu1 %v1229_v35 }
 0x267   : > { %1200 = vmatprep.subr.bf16.mxu1 %v1230_v36 }
 0x26a   : > { %1201 = vmatpush3.bf16.msra.mxu1 %v1230_v36 }
 0x330   : > { %v1180_v57 = vpop.f32.mrb[0].mxu1 }
 0x331   : > { %v669_v59 = vpop.f32.mrb[1].mxu1  ;;  %v1474_v4 = vadd.f32 %v1180_v57, %v1117_v58 }
 0x332   : > { %v1181_v60 = vpop.f32.mrb[2].mxu1  ;;  %v1470_v63 = vadd.f32 %v1117_v58, %v669_v59 }
 0x333   : > { %v1468_v61 = vadd.f32 %v1181_v60, %v1117_v58  ;;  %v672_v62 = vpop.f32.mrb[3].mxu1 }
 0x334   : > { %v1472_v3 = vadd.f32 %v1117_v58, %v672_v62 }
 0x335   : > { %v685_v7 = vpack.c.bf16 %v1468_v61, %v1474_v4 }
 0x336   : > { %v684_v5 = vpack.c.bf16 %v1472_v3, %v1470_v63 }
 0x338   : > { %1190 = vmatprep.mubr.msk.bf16.mxu0 %vm628_vm1, %v684_v5 }
 0x339   : > { %1191 = vmatmul.mubr.msk.bf16.vlgmr.msra.gmra.mrb[4].mxu0 %vm628_vm1, %v685_v7 }
 0x40c   : > { %v1192_v9 = vpop.f32.mrb[4].mxu0 }
 0x40d   : > { %v1485_v10 = vadd.f32 %v1192_v9, %v1124_v8  ;;  %v765_v11 = vpop.f32.mrb[5].mxu0 }
 0x40e   : > { %v1487_v12 = vadd.f32 %v1124_v8, %v765_v11  ;;  %v1193_v13 = vpop.f32.mrb[6].mxu0 }
 0x40f   : > { %848 = vrot.lane.b32.xlu1 %v1485_v10, %s1303_s22  ;;  %v768_v14 = vpop.f32.mrb[7].mxu0  ;;  %v1494_v16 = vadd.f32 %v1193_v13, %v1124_v8  ;;  %v786_v39 = vand.u32 2147483647, %v1485_v10  ;;  %v782_v34 = vmax.f32 %v1485_v10, 0.0 }
 0x410   : > { %v1490_v15 = vadd.f32 %v1124_v8, %v768_v14  ;;  %844 = vrot.lane.b32.xlu0 %v1487_v12, %s1303_s22  ;;  %v784_v37 = vand.u32 2147483647, %v1487_v12 }
 0x411   : > { %v790_v42 = vsub.f32 0.0, %v786_v39  ;;  %v787_v44 = vand.u32 2147483647, %v1494_v16 }
 0x412   : > { %v785_v38 = vand.u32 2147483647, %v1490_v15  ;;  %v788_v40 = vsub.f32 0.0, %v784_v37 }
 0x413   : > { %846 = vrot.lane.b32.xlu1 %v1490_v15, %s1303_s22  ;;  %v796_v46 = vmul.f32 1.442695, %v790_v42  ;;  %v791_v47 = vsub.f32 0.0, %v787_v44 }
 0x414   : > { %v789_v41 = vsub.f32 0.0, %v785_v38  ;;  %v792_v43 = vmul.f32 1.442695, %v788_v40 }
 0x415   : > { %v798_v48 = vmul.f32 1.442695, %v791_v47 }
 0x416   : > { %v794_v45 = vmul.f32 1.442695, %v789_v41  ;;  %1263 = vpow2.f32 %v792_v43  ;;  %v783_v41 = vmax.f32 %v1494_v16, 0.0 }
 0x417   : > { %850 = vrot.lane.b32.xlu1 %v1494_v16, %s1303_s22 }
 0x418   : > { %1265 = vpow2.f32 %v794_v45 }
 0x419   : > { %1267 = vpow2.f32 %v796_v46 }
 0x41a   : > { %1269 = vpow2.f32 %v798_v48 }
 0x481   : > { %v849_v17 = vpop.permute.xlu1 %848 }
 0x482   : > { %v845_v18 = vpop.permute.xlu0 %844  ;;  %v858_v22 = vmul.f32 %v849_v17, %v1485_v10 }
 0x483   : > { %v856_v19 = vmul.f32 %v845_v18, %v1487_v12 }
 0x485   : > { %v847_v20 = vpop.permute.xlu1 %846  ;;  %864 = vrot.lane.b32.xlu0 %v856_v19, %s1304_s23 }
 0x486   : > { %v857_v21 = vmul.f32 %v847_v20, %v1490_v15 }
 0x488   : > { %866 = vrot.lane.b32.xlu1 %v857_v21, %s1304_s23 }
 0x489   : > { %v851_v23 = vpop.permute.xlu1 %850  ;;  %868 = vrot.lane.b32.xlu0 %v858_v22, %s1304_s23 }
 0x48a   : > { %v859_v24 = vmul.f32 %v851_v23, %v1494_v16 }
 0x48c   : > { %870 = vrot.lane.b32.xlu1 %v859_v24, %s1304_s23  ;;  %v780_v24 = vmax.f32 %v1487_v12, 0.0 }
 0x4f7   : > { %v865_v25 = vpop.permute.xlu0 %864 }
 0x4f8   : > { %v877_v26 = vsel %vm876_vm2, %v865_v25, 0.0 }
 0x4f9   : > { %878 = vadd.xlane.f32.xlu0 %v877_v26 }
 0x4fa   : > { %v867_v27 = vpop.permute.xlu1 %866 }
 0x4fb   : > { %v869_v28 = vpop.permute.xlu0 %868  ;;  %v880_v29 = vsel %vm876_vm2, %v867_v27, 0.0 }
 0x4fc   : > { %881 = vadd.xlane.f32.xlu1 %v880_v29  ;;  %v883_v30 = vsel %vm876_vm2, %v869_v28, 0.0 }
 0x4fd   : > { %884 = vadd.xlane.f32.xlu0 %v883_v30 }
 0x4fe   : > { %v871_v31 = vpop.permute.xlu1 %870 }
 0x4ff   : > { %v886_v32 = vsel %vm876_vm2, %v871_v31, 0.0  ;;  %v781_v31 = vmax.f32 %v1490_v15, 0.0 }
 0x501   : > { %887 = vadd.xlane.f32.xlu0 %v886_v32 }
 0x50d   : > { %927 = vrot.lane.b32.xlu1 %v1449_v51, %s1305_s24 }
 0x511   : > { %929 = vrot.lane.b32.xlu1 %v1451_v52, %s1305_s24 }
 0x515   : > { %931 = vrot.lane.b32.xlu1 %v1445_v49, %s1305_s24  ;;  %v1264_v49 = vpop.eup %1263 }
 0x516   : > { %v800_v51 = vadd.f32 1.0, %v1264_v49  ;;  %v803_v57 = vmul.f32 -0.5, %v1264_v49  ;;  %v806_v5 = vand.u32 2147483647, %v1264_v49 }
 0x517   : > { %925 = vrot.lane.b32.xlu0 %v1447_v50, %s1305_s24  ;;  %v1266_v50 = vpop.eup %1265 }
 0x518   : > { %v1268_v52 = vpop.eup %1267  ;;  %v809_v53 = vadd.f32 1.0, %v1266_v50  ;;  %1271 = vlog2.f32 %v800_v51  ;;  %v812_v59 = vmul.f32 -0.5, %v1266_v50  ;;  %v804_v60 = vadd.f32 1.0, %v803_v57 }
 0x519   : > { %v818_v54 = vadd.f32 1.0, %v1268_v52  ;;  %v1270_v55 = vpop.eup %1269  ;;  %v821_v62 = vmul.f32 -0.5, %v1268_v52  ;;  %v815_v14 = vand.u32 2147483647, %v1266_v50  ;;  %vm807_vm3 = vcmp.lt.f32.partialorder %v806_v5, 0.0004427343 }
 0x51a   : > { %1273 = vlog2.f32 %v809_v53  ;;  %v827_v56 = vadd.f32 1.0, %v1270_v55  ;;  %v813_v11 = vadd.f32 1.0, %v812_v59  ;;  %v805_v13 = vmul.f32 %v1264_v49, %v804_v60 }
 0x51b   : > { %1275 = vlog2.f32 %v818_v54  ;;  %v822_v17 = vadd.f32 1.0, %v821_v62  ;;  %v830_v18 = vmul.f32 -0.5, %v1270_v55  ;;  %v824_v20 = vand.u32 2147483647, %v1268_v52 }
 0x51c   : > { %1277 = vlog2.f32 %v827_v56  ;;  %v814_v25 = vmul.f32 %v1266_v50, %v813_v11  ;;  %vm816_vm4 = vcmp.lt.f32.partialorder %v815_v14, 0.0004427343  ;;  %v833_v30 = vand.u32 2147483647, %v1270_v55 }
 0x51d   : > { %v823_v26 = vmul.f32 %v1268_v52, %v822_v17  ;;  %v831_v27 = vadd.f32 1.0, %v830_v18  ;;  %vm825_vm5 = vcmp.lt.f32.partialorder %v824_v20, 0.0004427343 }
 0x51e   : > { %vm834_vm6 = vcmp.lt.f32.partialorder %v833_v30, 0.0004427343 }
 0x51f   : > { %v832_v36 = vmul.f32 %v1270_v55, %v831_v27  ;;  %v1131_v27 = vld [vmem:[%s1560_s10] ss:$0 sm:$0xff] }
 0x522   : > { %v1272_v58 = vpop.eup %1271 }
 0x523   : > { %v802_v8 = vmul.f32 0.6931472, %v1272_v58 }
 0x524   : > { %v1274_v7 = vpop.eup %1273 }
 0x525   : > { %v1276_v9 = vpop.eup %1275  ;;  %v811_v19 = vmul.f32 0.6931472, %v1274_v7  ;;  %v808_v21 = vsel %vm807_vm3, %v805_v13, %v802_v8 }
 0x526   : > { %v820_v22 = vmul.f32 0.6931472, %v1276_v9  ;;  %v1278_v23 = vpop.eup %1277  ;;  %v836_v28 = vadd.f32 %v808_v21, %v780_v24 }
 0x527   : > { %v817_v29 = vsel %vm816_vm4, %v814_v25, %v811_v19  ;;  %v829_v33 = vmul.f32 0.6931472, %v1278_v23 }
 0x528   : > { %v826_v32 = vsel %vm825_vm5, %v823_v26, %v820_v22  ;;  %v837_v35 = vadd.f32 %v817_v29, %v781_v31  ;;  %v889_v37 = vmul.f32 %v836_v28, %v1470_v63 }
 0x529   : > { %v838_v38 = vadd.f32 %v826_v32, %v782_v34  ;;  %v835_v39 = vsel %vm834_vm6, %v832_v36, %v829_v33 }
 0x52a   : > { %v890_v42 = vmul.f32 %v837_v35, %v1472_v3  ;;  %v839_v45 = vadd.f32 %v835_v39, %v783_v41 }
 0x52b   : > { %v891_v15 = vmul.f32 %v838_v38, %v1474_v4 }
 0x52c   : > { %v892_v50 = vmul.f32 %v839_v45, %v1468_v61 }
 0x586   : > { %v879_v12 = vpop.xlane.xlu0 %878 }
 0x587   : > { %v893_v40 = vmul.f32 %v889_v37, %v879_v12 }
 0x589   : > { %v897_v43 = vsub.f32 0.0, %v893_v40  ;;  %v882_v44 = vpop.xlane.xlu1 %881 }
 0x58a   : > { %v894_v46 = vmul.f32 %v890_v42, %v882_v44  ;;  %v885_v10 = vpop.xlane.xlu0 %884 }
 0x58b   : > { %v901_v47 = vmul.f32 1.442695, %v897_v43  ;;  %v895_v48 = vmul.f32 %v891_v15, %v885_v10 }
 0x58c   : > { %v898_v49 = vsub.f32 0.0, %v894_v46 }
 0x58d   : > { %1279 = vpow2.f32 %v901_v47  ;;  %v899_v63 = vsub.f32 0.0, %v895_v48  ;;  %v928_v62 = vpop.permute.xlu1 %927 }
 0x58e   : > { %v903_v51 = vmul.f32 1.442695, %v898_v49  ;;  %v888_v52 = vpop.xlane.xlu0 %887 }
 0x58f   : > { %v905_v53 = vmul.f32 1.442695, %v899_v63  ;;  %v896_v16 = vmul.f32 %v892_v50, %v888_v52 }
 0x590   : > { %1281 = vpow2.f32 %v903_v51 }
 0x591   : > { %1283 = vpow2.f32 %v905_v53  ;;  %v900_v3 = vsub.f32 0.0, %v896_v16  ;;  %v930_v13 = vpop.permute.xlu1 %929 }
 0x592   : > { %v926_v14 = vpop.permute.xlu0 %925 }
 0x593   : > { %v907_v54 = vmul.f32 1.442695, %v900_v3 }
 0x595   : > { %1285 = vpow2.f32 %v907_v54  ;;  %v932_v23 = vpop.permute.xlu1 %931 }
 0x597   : > { %v1280_v4 = vpop.eup %1279 }
 0x598   : > { %v909_v55 = vadd.f32 1.0, %v1280_v4 }
 0x59a   : > { %v1282_v56 = vpop.eup %1281  ;;  %1287 = vrcp.f32 %v909_v55 }
 0x59b   : > { %v1284_v57 = vpop.eup %1283  ;;  %v910_v58 = vadd.f32 1.0, %v1282_v56 }
 0x59c   : > { %v911_v59 = vadd.f32 1.0, %v1284_v57 }
 0x59d   : > { %1289 = vrcp.f32 %v910_v58 }
 0x59e   : > { %1291 = vrcp.f32 %v911_v59 }
 0x59f   : > { %v1286_v60 = vpop.eup %1285 }
 0x5a0   : > { %v912_v61 = vadd.f32 1.0, %v1286_v60 }
 0x5a2   : > { %1293 = vrcp.f32 %v912_v61 }
 0x5a4   : > { %v1288_v5 = vpop.eup %1287 }
 0x5a5   : > { %v917_v7 = vmul.f32 %v1288_v5, %v893_v40 }
 0x5a7   : > { %v1290_v8 = vpop.eup %1289  ;;  %v937_v18 = vmul.f32 %v926_v14, %v917_v7 }
 0x5a8   : > { %v1292_v9 = vpop.eup %1291  ;;  %v918_v11 = vmul.f32 %v1290_v8, %v894_v46 }
 0x5a9   : > { %v919_v19 = vmul.f32 %v1292_v9, %v895_v48 }
 0x5aa   : > { %v938_v17 = vmul.f32 %v928_v62, %v918_v11 }
 0x5ab   : > { %v939_v24 = vmul.f32 %v930_v13, %v919_v19 }
 0x5ac   : > { %v1294_v20 = vpop.eup %1293  ;;  %v941_v21 = vpack.c.bf16 %v938_v17, %v937_v18 }
 0x5ad   : > { %v920_v22 = vmul.f32 %v1294_v20, %v896_v16 }
 0x5ae   : > { %1202 = vmatprep.mubr.msk.bf16.mxu1 %vm628_vm1, %v941_v21 }
 0x5af   : > { %v940_v25 = vmul.f32 %v932_v23, %v920_v22 }
 0x5b1   : > { %v942_v26 = vpack.c.bf16 %v940_v25, %v939_v24 }
 0x5b3   : > { %1203 = vmatmul.mubr.msk.bf16.vlgmr.msra.gmra.mrb[4].mxu1 %vm628_vm1, %v942_v26 }
 0x686   : > { %v1204_v28 = vpop.f32.mrb[4].mxu1 }
 0x687   : > { %v1022_v29 = vpop.f32.mrb[5].mxu1  ;;  %v1031_v32 = vadd.f32 %v1204_v28, %v1131_v27 }
 0x688   : > { %v1023_v30 = vadd.f32 %v1131_v27, %v1022_v29  ;;  %v1205_v31 = vpop.f32.mrb[6].mxu1 }
 0x689   : > { %v1025_v33 = vpop.f32.mrb[7].mxu1  ;;  %v1034_v35 = vadd.f32 %v1205_v31, %v1131_v27  ;;  %v1039_v38 = vadd.f32 %v1031_v32, %v1384_v1 }
 0x68a   : > { %v1037_v34 = vadd.f32 %v1023_v30, %v1382_v0  ;;  %v1026_v36 = vadd.f32 %v1131_v27, %v1025_v33 }
 0x68b   : > { %v1040_v12 = vadd.f32 %v1034_v35, %v1394_v6  ;;  %1043 = vst.msk [vmem:[%s388_s21 + $0x10] sm:$0xff] %vm400_vm0, %v1039_v38 }
 0x68c   : > { %1041 = vst.msk [vmem:[%s388_s21] sm:$0xff] %vm400_vm0, %v1037_v34  ;;  %v1038_v37 = vadd.f32 %v1026_v36, %v1386_v2 }
 0x68d   : > { %1044 = vst.msk [vmem:[%s388_s21 + $0x18] sm:$0xff] %vm400_vm0, %v1040_v12 }
 0x68e   : > { %1042 = vst.msk [vmem:[%s388_s21 + $0x8] sm:$0xff] %vm400_vm0, %v1038_v37 }
 0x68f PF: > { %s21_s17 = sadd.s32 1, %s1301_s17  }
 0x690   : > { %p18_p4 = scmp.ge.s32.totalorder %s21_s17, 4  }
 0x692   :  { %20 = sbr.rel (!%p18_p4) target bundleno = 1 (0x1), region = 94 }

</bundles_post_ra>
